<compile_context>
chip_gen: v7x
topology: tpu7x:2x2x1
jax: 0.10.0
libtpu: 0.0.40
codegen_flags: <defaults>
</compile_context>

<pallas_src>
import functools

import jax
import jax.numpy as jnp
from jax import lax
from jax.experimental import pallas as pl
from jax.experimental.pallas import tpu as pltpu

_LANE = 128
_SUBLANE = 8
_VMEM_TILE_BUDGET = 20 * 1024 * 1024   # target working set for one batch tile
_VMEM_LIMIT_BYTES = 40 * 1024 * 1024   # scoped-VMEM request (< v7x's 64 MiB / TC)


def _round_up(n, m):
    return ((n + m - 1) // m) * m


def _choose_batch_tile(d_in, hidden_sizes, x_itemsize, mm_itemsize, tile_b_max):
    """Largest batch tile (multiple of 512 rows) whose working set fits the budget."""
    h_max = max(hidden_sizes) if hidden_sizes else 1
    # Fixed cost: resident parameters (conservatively counted double-buffered).
    dims = (d_in,) + tuple(hidden_sizes)
    w_bytes = sum(dims[i] * dims[i + 1] * mm_itemsize + dims[i + 1] * 4
                  for i in range(len(hidden_sizes)))
    w_bytes += dims[-1] * 4 + 4                       # f32 head weight + bias
    fixed = 2 * w_bytes
    # Per-batch-row cost: double-buffered lane-padded x tile, a few live f32
    # transposed (features, tile_b) activations + one matmul-dtype copy, and the
    # double-buffered (1, 1, tile_b) output row (sublane-padded).
    per_row = (2 * _round_up(d_in, _LANE) * x_itemsize
               + 3 * 4 * h_max + mm_itemsize * h_max
               + 2 * _SUBLANE * 4)
    tb = max(_VMEM_TILE_BUDGET - fixed, 0) // per_row
    tb = (tb // 512) * 512
    return int(max(512, min(tile_b_max, tb)))


def _make_mlp_kernel(num_hidden):
    """MLP kernel with `num_hidden` Linear+ReLU layers and a Linear(1)+Sigmoid head.

    Ref layout (per grid step):
      refs[0]        : x tile      (TB, D_in)        caller dtype (cast in-kernel)
      refs[1 + 2i]   : hidden W_i  (H_i, H_{i-1})    torch (out, in) layout, mm dtype
      refs[2 + 2i]   : hidden b_i  (H_i, 1)          f32 column (VMEM)
      refs[-3]       : w_out       (1, H_last)       f32
      refs[-2]       : b_out       (1, 1)            f32 (SMEM scalar)
      refs[-1]       : out tile    (1, 1, TB)        f32, lane-dense
    Hidden activations are carried transposed as (features, TB) so every
    elementwise op runs on full 128-lane vregs.
    """

    def kernel(*refs):
        x_ref = refs[0]
        o_ref = refs[-1]
        param_refs = refs[1:-1]
        assert len(param_refs) == 2 * num_hidden + 2

        h = x_ref[...]            # (TB, D_in) until the first layer transposes it
        batch_major = True
        for li in range(num_hidden):
            w_ref = param_refs[2 * li]          # (out, in) matmul dtype
            b_ref = param_refs[2 * li + 1]      # (out, 1)  f32
            rhs = h.astype(w_ref.dtype)         # in-kernel cast (hidden under DMA)
            rhs_contract = 1 if batch_major else 0
            # (out, in) . (TB, in)^T -> (out, TB)   [first layer, flash-attn style]
            # (out, in) . (in, TB)   -> (out, TB)   [subsequent layers, standard]
            h = lax.dot_general(
                w_ref[...], rhs,
                dimension_numbers=(((1,), (rhs_contract,)), ((), ())),
                preferred_element_type=jnp.float32)
            h = jnp.maximum(h + b_ref[...], 0.0)   # f32 bias + ReLU on dense vregs
            batch_major = False

        w_out_ref = param_refs[-2]              # (1, H_last) f32
        b_out_ref = param_refs[-1]              # (1, 1) f32 in SMEM
        rhs_contract = 1 if batch_major else 0
        z = lax.dot_general(
            w_out_ref[...], h.astype(jnp.float32),
            dimension_numbers=(((1,), (rhs_contract,)), ((), ())),
            preferred_element_type=jnp.float32)           # (1, TB) lane-dense logits
        z = z + b_out_ref[0, 0]
        p = 1.0 / (1.0 + jnp.exp(-z))                     # exact sigmoid (EUP exp)
        o_ref[...] = p[None].astype(o_ref.dtype)          # (1, 1, TB)

    return kernel


@functools.partial(jax.jit,
                   static_argnames=("tile_b_max", "use_bf16", "core_parallel"))
def cnetwork_cont_forward(x, params, *, tile_b_max=16384, use_bf16=True,
                          core_parallel=False):
    """CNetworkCont forward via pallas_call, tiled over the batch.

    params = (w1, b1, ..., wk, bk, w_out, b_out) in torch-native layouts:
    hidden wi of shape (out, in), bi of shape (out,), w_out (1, H_last), b_out (1,).
    """
    params = tuple(params)
    assert len(params) >= 2 and len(params) % 2 == 0
    num_hidden = len(params) // 2 - 1

    B, d_in = x.shape
    hidden_sizes = tuple(params[2 * li].shape[0] for li in range(num_hidden))
    mm_dtype = jnp.bfloat16 if use_bf16 else jnp.float32

    tb = _choose_batch_tile(d_in, hidden_sizes, x.dtype.itemsize,
                            jnp.dtype(mm_dtype).itemsize, tile_b_max)
    tb = min(tb, _round_up(B, _SUBLANE))          # don't exceed the batch
    num_tiles = pl.cdiv(B, tb)                    # cdiv grid: no padding copy of x

    operands = [x]                                # streamed untouched (no HBM copy)
    in_specs = [pl.BlockSpec((tb, d_in), lambda i: (i, 0))]

    for li in range(num_hidden):
        w, b = params[2 * li], params[2 * li + 1]  # (out, in), (out,)
        out_f, in_f = w.shape
        operands.append(w.astype(mm_dtype))        # tiny; VMEM-resident across grid
        in_specs.append(pl.BlockSpec((out_f, in_f), lambda i: (0, 0)))
        operands.append(b.astype(jnp.float32).reshape(out_f, 1))
        in_specs.append(pl.BlockSpec((out_f, 1), lambda i: (0, 0)))

    w_out, b_out = params[-2], params[-1]          # (1, H_last), (1,)
    h_last = w_out.shape[-1]
    operands.append(w_out.astype(jnp.float32).reshape(1, h_last))
    in_specs.append(pl.BlockSpec((1, h_last), lambda i: (0, 0)))
    operands.append(b_out.astype(jnp.float32).reshape(1, 1))
    in_specs.append(pl.BlockSpec(memory_space=pltpu.MemorySpace.SMEM))

    # Lane-dense output: (num_tiles, 1, tile_b); reshaped to (B, 1) below.
    out_specs = pl.BlockSpec((1, 1, tb), lambda i: (i, 0, 0))
    out_shape = jax.ShapeDtypeStruct((num_tiles, 1, tb), jnp.float32)

    # Advisory cost estimate for XLA's scheduler around this short kernel.
    dims = (d_in,) + hidden_sizes + (1,)
    flops = 2 * B * sum(a * b for a, b in zip(dims[:-1], dims[1:]))
    param_bytes = sum(int(p.size) * p.dtype.itemsize for p in params)
    cost = pl.CostEstimate(
        flops=int(flops),
        transcendentals=int(2 * B),
        bytes_accessed=int(x.size) * x.dtype.itemsize + param_bytes + B * 4)

    # "parallel" is safe everywhere; CORE_PARALLEL explicitly shards the batch
    # grid across v7x's two TensorCores (requires num_tiles >= 2 to matter).
    semantics = (pltpu.CORE_PARALLEL,) if core_parallel else ("parallel",)

    out = pl.pallas_call(
        _make_mlp_kernel(num_hidden),
        out_shape=out_shape,
        grid=(num_tiles,),
        in_specs=in_specs,
        out_specs=out_specs,
        compiler_params=pltpu.CompilerParams(
            dimension_semantics=semantics,
            vmem_limit_bytes=_VMEM_LIMIT_BYTES),
        cost_estimate=cost,
    )(*operands)

    return out.reshape(num_tiles * tb, 1)[:B]


def init_params(key, d_in, hidden_layer_sizes):
    """torch.nn.Linear default init, torch-native layouts: W (out, in), b (out,)."""
    params = []
    prev = d_in
    for h in tuple(hidden_layer_sizes) + (1,):
        key, kw, kb = jax.random.split(key, 3)
        bound = 1.0 / float(prev) ** 0.5
        params.append(jax.random.uniform(kw, (h, prev), jnp.float32, -bound, bound))
        params.append(jax.random.uniform(kb, (h,), jnp.float32, -bound, bound))
        prev = h
    return tuple(params)


def reference_forward(x, params, use_bf16=True):
    """Pure-JAX reference mirroring the kernel's dtype handling."""
    params = tuple(params)
    num_hidden = len(params) // 2 - 1
    mm = jnp.bfloat16 if use_bf16 else jnp.float32
    h = x
    for li in range(num_hidden):
        w, b = params[2 * li], params[2 * li + 1]      # (out, in), (out,)
        h = jnp.dot(h.astype(mm), w.astype(mm).T,
                    preferred_element_type=jnp.float32) + b[None, :]
        h = jnp.maximum(h, 0.0)
    w_out, b_out = params[-2], params[-1]
    z = jnp.dot(h.astype(jnp.float32), w_out.astype(jnp.float32).T,
                preferred_element_type=jnp.float32) + b_out[None, :]
    return jax.nn.sigmoid(z)


if __name__ == "__main__":
    # Module config: d_obs + d_goal + d_actions + 1 input features.
    d_obs, d_goal, d_actions = 16, 8, 7
    d_in = d_obs + d_goal + d_actions + 1          # = 32
    hidden_layer_sizes = (32, 32)
    batch = 16                                     # small demo batch (kernel tiles any B)

    key = jax.random.PRNGKey(0)
    kx, kp = jax.random.split(key)
    x = jax.random.normal(kx, (batch, d_in), dtype=jnp.float32)
    params = init_params(kp, d_in, hidden_layer_sizes)

    out = cnetwork_cont_forward(x, params)         # defaults: auto tile, use_bf16=True
    out = jax.block_until_ready(out)

    ref = reference_forward(x, params, use_bf16=True)
    assert out.shape == (batch, 1)
    assert jnp.allclose(out, ref, atol=2e-3, rtol=2e-3), "mismatch vs reference"

    print("KERNEL_OK")
</pallas_src>

<mosaic_0001>
module attributes {stable_mosaic.version = 11 : i64} {
  func.func @kernel(%arg0: i32, %arg1: memref<16x32xf32, #tpu.memory_space<vmem>>, %arg2: memref<32x32xbf16, #tpu.memory_space<vmem>>, %arg3: memref<32x1xf32, #tpu.memory_space<vmem>>, %arg4: memref<32x32xbf16, #tpu.memory_space<vmem>>, %arg5: memref<32x1xf32, #tpu.memory_space<vmem>>, %arg6: memref<1x32xf32, #tpu.memory_space<vmem>>, %arg7: memref<1x1xf32, #tpu.memory_space<smem>>, %arg8: memref<1x1x16xf32, #tpu.memory_space<vmem>>) attributes {dimension_semantics = [#tpu.dimension_semantics<parallel>], iteration_bounds = array<i64: 1>, scalar_prefetch = 0 : i64, scratch_operands = 0 : i64, tpu.core_type = #tpu.core_type<tc>, window_params = [{transform_indices = @transform_0, window_bounds = array<i64: 16, 32>}, {pipeline_mode = #tpu.pipeline_mode<synchronous>, transform_indices = @transform_1, window_bounds = array<i64: 32, 32>}, {pipeline_mode = #tpu.pipeline_mode<synchronous>, transform_indices = @transform_2, window_bounds = array<i64: 32, 1>}, {pipeline_mode = #tpu.pipeline_mode<synchronous>, transform_indices = @transform_3, window_bounds = array<i64: 32, 32>}, {pipeline_mode = #tpu.pipeline_mode<synchronous>, transform_indices = @transform_4, window_bounds = array<i64: 32, 1>}, {pipeline_mode = #tpu.pipeline_mode<synchronous>, transform_indices = @transform_5, window_bounds = array<i64: 1, 32>}, {transform_indices = @transform_6, window_bounds = array<i64: 1, 1>}, {transform_indices = @transform_7, window_bounds = array<i64: 1, 1, 16>}]} {
    %c0 = arith.constant 0 : index
    %c0_0 = arith.constant 0 : index
    %0 = vector.load %arg1[%c0, %c0_0] : memref<16x32xf32, #tpu.memory_space<vmem>>, vector<16x32xf32>
    %1 = arith.truncf %0 : vector<16x32xf32> to vector<16x32xbf16>
    %c0_1 = arith.constant 0 : index
    %c0_2 = arith.constant 0 : index
    %2 = vector.load %arg2[%c0_1, %c0_2] : memref<32x32xbf16, #tpu.memory_space<vmem>>, vector<32x32xbf16>
    %cst = arith.constant dense<0.000000e+00> : vector<32x16xf32>
    %3 = tpu.matmul %2, %1, %cst {dimension_numbers = #tpu.dot_dimension_numbers<[1], [1], [0], [0], [0, 0, 1, 0], [], []>} : vector<32x32xbf16>, vector<16x32xbf16>, vector<32x16xf32> -> vector<32x16xf32>
    %c0_3 = arith.constant 0 : index
    %c0_4 = arith.constant 0 : index
    %4 = vector.load %arg3[%c0_3, %c0_4] : memref<32x1xf32, #tpu.memory_space<vmem>>, vector<32x1xf32>
    %5 = vector.broadcast %4 : vector<32x1xf32> to vector<32x16xf32>
    %6 = arith.addf %3, %5 : vector<32x16xf32>
    %cst_5 = arith.constant 0.000000e+00 : f32
    %7 = vector.broadcast %cst_5 : f32 to vector<32x16xf32>
    %8 = arith.maximumf %6, %7 : vector<32x16xf32>
    %9 = arith.truncf %8 : vector<32x16xf32> to vector<32x16xbf16>
    %c0_6 = arith.constant 0 : index
    %c0_7 = arith.constant 0 : index
    %10 = vector.load %arg4[%c0_6, %c0_7] : memref<32x32xbf16, #tpu.memory_space<vmem>>, vector<32x32xbf16>
    %cst_8 = arith.constant dense<0.000000e+00> : vector<32x16xf32>
    %11 = tpu.matmul %10, %9, %cst_8 {dimension_numbers = #tpu.dot_dimension_numbers<[1], [0], [0], [1], [0, 0, 1, 1], [], []>} : vector<32x32xbf16>, vector<32x16xbf16>, vector<32x16xf32> -> vector<32x16xf32>
    %c0_9 = arith.constant 0 : index
    %c0_10 = arith.constant 0 : index
    %12 = vector.load %arg5[%c0_9, %c0_10] : memref<32x1xf32, #tpu.memory_space<vmem>>, vector<32x1xf32>
    %13 = vector.broadcast %12 : vector<32x1xf32> to vector<32x16xf32>
    %14 = arith.addf %11, %13 : vector<32x16xf32>
    %cst_11 = arith.constant 0.000000e+00 : f32
    %15 = vector.broadcast %cst_11 : f32 to vector<32x16xf32>
    %16 = arith.maximumf %14, %15 : vector<32x16xf32>
    %c0_12 = arith.constant 0 : index
    %c0_13 = arith.constant 0 : index
    %17 = vector.load %arg6[%c0_12, %c0_13] : memref<1x32xf32, #tpu.memory_space<vmem>>, vector<1x32xf32>
    %cst_14 = arith.constant dense<0.000000e+00> : vector<1x16xf32>
    %18 = tpu.matmul %17, %16, %cst_14 {dimension_numbers = #tpu.dot_dimension_numbers<[1], [0], [0], [1], [0, 0, 1, 1], [], []>} : vector<1x32xf32>, vector<32x16xf32>, vector<1x16xf32> -> vector<1x16xf32>
    %c0_15 = arith.constant 0 : index
    %c0_16 = arith.constant 0 : index
    %19 = memref.load %arg7[%c0_15, %c0_16] : memref<1x1xf32, #tpu.memory_space<smem>>
    %20 = vector.broadcast %19 : f32 to vector<1x16xf32>
    %21 = arith.addf %18, %20 : vector<1x16xf32>
    %cst_17 = arith.constant 0.000000e+00 : f32
    %22 = vector.broadcast %cst_17 : f32 to vector<1x16xf32>
    %23 = arith.subf %22, %21 : vector<1x16xf32>
    %24 = math.exp %23 : vector<1x16xf32>
    %cst_18 = arith.constant 1.000000e+00 : f32
    %25 = vector.broadcast %cst_18 : f32 to vector<1x16xf32>
    %26 = arith.addf %25, %24 : vector<1x16xf32>
    %cst_19 = arith.constant 1.000000e+00 : f32
    %27 = vector.broadcast %cst_19 : f32 to vector<1x16xf32>
    %28 = arith.divf %27, %26 : vector<1x16xf32>
    %29 = vector.shape_cast %28 : vector<1x16xf32> to vector<1x1x16xf32>
    %c0_20 = arith.constant 0 : index
    %c0_21 = arith.constant 0 : index
    %c0_22 = arith.constant 0 : index
    %30 = vector.load %arg8[%c0_20, %c0_21, %c0_22] : memref<1x1x16xf32, #tpu.memory_space<vmem>>, vector<1x1x16xf32>
    tpu.vector_store %arg8[%c0_20, %c0_21, %c0_22], %29 {strides = array<i32>} : memref<1x1x16xf32, #tpu.memory_space<vmem>>, vector<1x1x16xf32>,
    return
  }
  func.func @transform_0(%arg0: i32) -> (i32, i32) {
    %c0_i32 = arith.constant 0 : i32
    %c0_i32_0 = arith.constant 0 : i32
    return %arg0, %c0_i32 : i32, i32
  }
  func.func @transform_1(%arg0: i32) -> (i32, i32) {
    %c0_i32 = arith.constant 0 : i32
    %c0_i32_0 = arith.constant 0 : i32
    %c0_i32_1 = arith.constant 0 : i32
    return %c0_i32, %c0_i32_0 : i32, i32
  }
  func.func @transform_2(%arg0: i32) -> (i32, i32) {
    %c0_i32 = arith.constant 0 : i32
    %c0_i32_0 = arith.constant 0 : i32
    %c0_i32_1 = arith.constant 0 : i32
    return %c0_i32, %c0_i32_0 : i32, i32
  }
  func.func @transform_3(%arg0: i32) -> (i32, i32) {
    %c0_i32 = arith.constant 0 : i32
    %c0_i32_0 = arith.constant 0 : i32
    %c0_i32_1 = arith.constant 0 : i32
    return %c0_i32, %c0_i32_0 : i32, i32
  }
  func.func @transform_4(%arg0: i32) -> (i32, i32) {
    %c0_i32 = arith.constant 0 : i32
    %c0_i32_0 = arith.constant 0 : i32
    %c0_i32_1 = arith.constant 0 : i32
    return %c0_i32, %c0_i32_0 : i32, i32
  }
  func.func @transform_5(%arg0: i32) -> (i32, i32) {
    %c0_i32 = arith.constant 0 : i32
    %c0_i32_0 = arith.constant 0 : i32
    %c0_i32_1 = arith.constant 0 : i32
    return %c0_i32, %c0_i32_0 : i32, i32
  }
  func.func @transform_6(%arg0: i32) -> (i32, i32) {
    %c0_i32 = arith.constant 0 : i32
    %c0_i32_0 = arith.constant 0 : i32
    %c0_i32_1 = arith.constant 0 : i32
    return %c0_i32, %c0_i32_0 : i32, i32
  }
  func.func @transform_7(%arg0: i32) -> (i32, i32, i32) {
    %c0_i32 = arith.constant 0 : i32
    %c0_i32_0 = arith.constant 0 : i32
    %c0_i32_1 = arith.constant 0 : i32
    return %arg0, %c0_i32, %c0_i32_0 : i32, i32, i32
  }
}

</mosaic_0001>

<bundles_post_ra>
// kernel: cnetwork_cont_forward.1
= control target key start
LH: loop header
LB: loop body
LE: loop exit
PB: predicated region body
PF: predicated region fallthrough
CT: control target
= control target key end

     0   :  { %vm70_vm0 = vcmask 261120   ;;  %v422_v4 = vmov 0   ;;  %s534_s0 = inlined_call_operand.vmem [shape: f32[16,32], index: 0, kind: input, shape index: {}]   ;;  %s535_s1 = inlined_call_operand.vmem [shape: bf16[32,32], index: 1, kind: input, shape index: {}]   ;;  %s536_s2 = inlined_call_operand.vmem [shape: f32[32,1], index: 2, kind: input, shape index: {}]   ;;  %s537_s3 = inlined_call_operand.vmem [shape: bf16[32,32], index: 3, kind: input, shape index: {}]   ;;  %s538_s4 = inlined_call_operand.vmem [shape: f32[32,1], index: 4, kind: input, shape index: {}]   ;;  %s539_s5 = inlined_call_operand.vmem [shape: f32[1,32], index: 5, kind: input, shape index: {}]   ;;  %s540_s6 = inlined_call_operand.<no memory space> [shape: f32[1,1], index: 6, kind: input, shape index: {}]   ;;  %s541_s7 = inlined_call_operand.hbm [shape: f32[1,1,16], index: 7, kind: output, shape index: {}]  }
   0x1   :  { %v29_v0 = vld [vmem:[%s534_s0] sm:$0xff]  ;;  %v30_v1 = vld [vmem:[%s534_s0 + $0x8] sm:$0xff]  ;;  %388 = vset.pattern.permute.xlu0 %v422_v4  ;;  %389 = vset.pattern.permute.xlu1 %v422_v4  ;;  %v38_v7 = vld [vmem:[%s536_s2 + $0x10] sm:$0xff] }
   0x2   :  { %v31_v2 = vpack.c.bf16 %v30_v1, %v29_v0  ;;  %v390_v3 = vld [vmem:[%s535_s1] sm:$0xff]   ;;  %v37_v8 = vld [vmem:[%s536_s2 + $0x8] sm:$0xff]  ;;  %52 = vperm.xlu1 %389, %v38_v7   ;;  %v39_v9 = vld [vmem:[%s536_s2 + $0x18] sm:$0xff] }
   0x3   :  { %v36_v5 = vld [vmem:[%s536_s2] sm:$0xff]  ;;  %353 = vmatprep.mubr.msk.bf16.mxu0 %vm70_vm0, %v390_v3 }
   0x4   :  { %382 = vmatprep.subr.msk.bf16.mxu0 %vm70_vm0, %v31_v2  ;;  %v78_v6 = vsel %vm70_vm0, %v31_v2, 0  ;;  %42 = vperm.xlu0 %388, %v36_v5  }
   0x5   :  { %352 = vmatpush3.bf16.xpose.msra.mxu0 %v78_v6 }
   0x6   :  { %13 = vsyncpa [#allocation4], 0  ;;  %v391_v10 = vld [vmem:[%s535_s1 + $0x8] sm:$0xff]   ;;  %57 = vperm.xlu1 %389, %v39_v9   ;;  %v139_v11 = vld [vmem:[%s538_s4] sm:$0xff]  ;;  %v423_v35 = vmov 0.0|0.0   ;;  %vm424_vm1 = vmmov 0   ;;  %v234_v56 = vstv %s540_s6 }
   0x7   :  { %v140_v12 = vld [vmem:[%s538_s4 + $0x8] sm:$0xff]  ;;  %v141_v13 = vld [vmem:[%s538_s4 + $0x10] sm:$0xff]  ;;  %v142_v14 = vld [vmem:[%s538_s4 + $0x18] sm:$0xff]  ;;  %376 = vmatprep.subr.bf16.mxu0 %v423_v35  ;;  %v425_v36 = vmov 0.0   ;;  %s426_s28 = smov [#allocation3]   ;;  %vm314_vm2 = vcmask 122880  }
   0x8   :  { %47 = vperm.xlu0 %388, %v37_v8   ;;  %v392_v15 = vld [vmem:[%s537_s3] sm:$0xff]   ;;  %v393_v34 = vld [vmem:[%s537_s3 + $0x8] sm:$0xff]   ;;  %s322_s29 = sshll.u32 %s426_s28, 4  ;;  %s323_s29 = int_to_ptr.vmem [resolvable:$true] %s322_s29 }
   0x9   :  { %361 = vmatprep.mubr.msk.bf16.mxu1 %vm70_vm0, %v392_v15  ;;  %v232_v55 = vld [vmem:[%s539_s5] sm:$0x1]  ;;  %s398_s5 = scalar_lea.vmem %s323_s29, 16  ;;  %s402_s30 = scalar_lea.vmem %s323_s29, 32 }
   0xa   :  { %150 = vperm.xlu1 %389, %v140_v12   ;;  %p399_p0 = scmp.ne.s32.totalorder %s323_s29, %s398_s5  ;;  %p403_p1 = scmp.lt.s32.totalorder %s323_s29, %s323_s29 }
   0xb   :  { %p404_p2 = scmp.lt.s32.totalorder %s402_s30, %s398_s5 }
   0xc   :  { %354 = vmatmul.mubr.msk.bf16.vlgmr.msra.gmra.mrb[0].mxu0 %vm70_vm0, %v391_v10  ;;  %145 = vperm.xlu0 %388, %v139_v11  }
   0xd   :  { %373 = vmatprep.mubr.msk.f32.mxu0 %vm424_vm1, %v425_v36  ;;  %p405_p3 = por %p404_p2, %p403_p1 }
   0xe   :  { %160 = vperm.xlu1 %389, %v142_v14  }
   0xf   :  { %p406_p4 = pnand %p405_p3, %p399_p0 }
  0x10   :  { %155 = vperm.xlu0 %388, %v141_v13  }
  0x81   :  { %v53_v16 = vpop.permute.xlu1 %52 }
  0x83   :  { %v43_v17 = vpop.permute.xlu0 %42 }
  0x85   :  { %v58_v21 = vpop.permute.xlu1 %57 }
  0x87   :  { %v48_v24 = vpop.permute.xlu0 %47 }
  0x89   :  { %v151_v38 = vpop.permute.xlu1 %150 }
  0x8b   :  { %v146_v37 = vpop.permute.xlu0 %145 }
  0x8d   :  { %v161_v43 = vpop.permute.xlu1 %160 }
  0x8f   :  { %v156_v39 = vpop.permute.xlu0 %155 }
  0xdf   :  { %v355_v18 = vpop.f32.mrb[0].mxu0 }
  0xe0   :  { %v123_v19 = vadd.f32 %v355_v18, %v53_v16  ;;  %v114_v20 = vpop.f32.mrb[1].mxu0 }
  0xe1   :  { %v115_v22 = vadd.f32 %v114_v20, %v43_v17  ;;  %v356_v23 = vpop.f32.mrb[2].mxu0 }
  0xe2   :  { %v126_v25 = vadd.f32 %v356_v23, %v58_v21  ;;  %v117_v26 = vpop.f32.mrb[3].mxu0  ;;  %v131_v28 = vmax.f32 %v123_v19, 0.0 }
  0xe3   :  { %v118_v27 = vadd.f32 %v117_v26, %v48_v24  ;;  %v129_v30 = vmax.f32 %v115_v22, 0.0 }
  0xe4   :  { %v132_v29 = vmax.f32 %v126_v25, 0.0 }
  0xe5   :  { %v130_v31 = vmax.f32 %v118_v27, 0.0 }
  0xe6   :  { %v134_v32 = vpack.c.bf16 %v132_v29, %v131_v28 }
  0xe7   :  { %v133_v33 = vpack.c.bf16 %v130_v31, %v129_v30 }
  0xe9   :  { %357 = vmatprep.subr.bf16.mxu1 %v133_v33 }
  0xea   :  { %358 = vmatpush3.bf16.msra.mxu1 %v133_v33 }
  0xeb   :  { %359 = vmatprep.subr.bf16.mxu1 %v134_v32 }
  0xee   :  { %360 = vmatpush3.bf16.msra.mxu1 %v134_v32 }
  0xf1   :  { %362 = vmatmul.mubr.msk.bf16.vlgmr.msra.gmra.mrb[0].mxu1 %vm70_vm0, %v393_v34 }
 0x1c4   :  { %v363_v40 = vpop.f32.mrb[0].mxu1 }
 0x1c5   :  { %v222_v41 = vadd.f32 %v363_v40, %v156_v39  ;;  %v213_v42 = vpop.f32.mrb[1].mxu1 }
 0x1c6   :  { %v214_v44 = vadd.f32 %v213_v42, %v146_v37  ;;  %v364_v45 = vpop.f32.mrb[2].mxu1 }
 0x1c7   :  { %v225_v46 = vadd.f32 %v364_v45, %v161_v43  ;;  %v216_v47 = vpop.f32.mrb[3].mxu1  ;;  %v230_v49 = vmax.f32 %v222_v41, 0.0 }
 0x1c8   :  { %v217_v48 = vadd.f32 %v216_v47, %v151_v38  ;;  %v228_v51 = vmax.f32 %v214_v44, 0.0 }
 0x1c9   :  { %v231_v50 = vmax.f32 %v225_v46, 0.0 }
 0x1ca   :  { %v229_v52 = vmax.f32 %v217_v48, 0.0 }
 0x1cb   :  { %v380_v53 = vpack.c.bf16 %v231_v50, %v230_v49 }
 0x1cc   :  { %v377_v54 = vpack.c.bf16 %v229_v52, %v228_v51 }
 0x1ce   :  { %378 = vmatpush3.bf16.msra.mxu0 %v377_v54 }
 0x1cf   :  { %379 = vmatprep.subr.bf16.mxu0 %v423_v35 }
 0x1d2   :  { %381 = vmatpush3.bf16.msra.mxu0 %v380_v53 }
 0x1d5   :  { %374 = vmatmul.mubr.msk.f32.vlgmr.msra.gmra.mrb[4].mxu0 %vm70_vm0, %v232_v55 }
 0x2a8   :  { %v304_v57 = vpop.f32.mrb[4].mxu0 }
 0x2a9   :  { %v305_v58 = vadd.f32 %v304_v57, %v234_v56  ;;  %v375_v59 = vpop.f32.mrb[5].mxu0 }
 0x2ab   :  { %v308_v60 = vsub.f32 0.0, %v305_v58 }
 0x2ad   :  { %v309_v61 = vmul.f32 1.442695, %v308_v60 }
 0x2af   :  { %394 = vpow2.f32 %v309_v61 }
 0x2b9   :  { %v395_v62 = vpop.eup %394 }
 0x2ba   :  { %v311_v63 = vadd.f32 1.0, %v395_v62 }
 0x2bc   :  { %396 = vrcp.f32 %v311_v63 }
 0x2c6   :  { %v397_v0 = vpop.eup %396 }
 0x2c7   :  { %315 = vst.msk [vmem:[#allocation3] sm:$0x1] %vm314_vm2, %v397_v0 }
 0x2c8   :  { %409 = shalt.err (!%p406_p4)
}
 0x2c9   :  { %s410_s0 = scalar_lea.hbm %s541_s7, 16 }
 0x2ca   :  { %p411_p5 = scmp.ne.s32.totalorder %s541_s7, %s410_s0  ;;  %p414_p6 = scmp.lt.u32.totalorder %s410_s0, %s541_s7 }
 0x2cc   :  { %p416_p7 = pnand %p414_p6, %p411_p5 }
 0x2ce   :  { %419 = shalt.err (!%p416_p7)
}
 0x2cf   :  { %325 = dma.vmem_to_hbm [thread:$0]  %s323_s29, 16, %s541_s7, [#allocation4]  }
 0x2d0   :  { %420 = dma.done.wait [#allocation4], 16  }
 0x2d1   :  { %421 = vsyncadd [#allocation4], 4294967280 }
 0x2d2   :  { %329 = vsyncpa [#allocation4], 1 }

</bundles_post_ra>
